<compile_context>
chip_gen: v5e
topology: v5e:2x2
jax: 0.10.0
libtpu: 0.0.40
codegen_flags: <defaults>
</compile_context>

<pallas_src>
import functools

import jax
import jax.numpy as jnp
from jax.experimental import pallas as pl
from jax.experimental.pallas import tpu as pltpu

# Compat shim (older releases expose TPUCompilerParams).
_CompilerParams = getattr(pltpu, "CompilerParams", None) or getattr(
    pltpu, "TPUCompilerParams")


def _round_up(x, m):
    return ((x + m - 1) // m) * m


def _pad_to(x, target_shape):
    pads = [(0, t - s) for s, t in zip(x.shape, target_shape)]
    if any(hi for _, hi in pads):
        x = jnp.pad(x, pads)
    return x


def _vmem_capacity_bytes():
    """Generation-aware VMEM capacity; conservative (v7x) fallback."""
    try:
        cap = int(pltpu.get_tpu_info().vmem_capacity_bytes)
        if cap > 0:
            return cap
    except Exception:
        pass
    return 64 * 2**20


def _is_multi_tc_chip():
    """True on chips with >1 TensorCore per device (v7x, v4, v5p)."""
    try:
        kind = jax.devices()[0].device_kind.lower()
    except Exception:
        return False
    return ("v7" in kind) or ("7x" in kind) or ("v4" in kind) or ("v5p" in kind)


def _choose_batch_tile(batch, s_pad, h_pad, weight_itemsize, vmem_cap, multi_tc):
    """Pick TB so TB*S_pad fills the MXU M-dim without blowing VMEM."""
    target_rows = 512                       # ~2x a 256-row MXU pass (v6e/v7x)
    tb = max(1, target_rows // s_pad)
    if multi_tc and batch >= 2:
        tb = min(tb, -(-batch // 2))        # keep >=2 grid steps for 2 TCs
    tb = min(tb, batch)

    def footprint(t):
        tile = t * s_pad * h_pad
        return (2 * tile * 4                          # double-buffered f32 out tile
                + 3 * tile * 4                        # f32 temps: energy, score prod, ctx prod
                + 2 * h_pad * h_pad * weight_itemsize  # double-buffered W_attn^T
                + 2 * t * h_pad * 4                   # hidden_last tile (x2)
                + 2 * t * (h_pad + s_pad) * 4         # outputs (x2)
                + 2 * h_pad * 4)                      # score row (x2)

    budget = int(vmem_cap * 0.45)           # headroom for compiler scratch
    while tb > 1 and footprint(tb) > budget:
        tb //= 2
    tb = max(tb, 1)
    return tb, footprint(tb)


def _attention_kernel(out_ref, hlast_ref, wattn_t_ref, wscore_ref,
                      ctx_ref, attw_ref, *, seq_len, tb, s_pad, h_pad,
                      mm_dtype):
    # out_ref:     (TB, S_pad, H_pad)  LSTM outputs tile (f32)
    # hlast_ref:   (TB, H_pad)         hidden[-1] + b_attn (f32)
    # wattn_t_ref: (H_pad, H_pad)      attention_weights.weight^T (mm_dtype)
    # wscore_ref:  (1, H_pad)          score.weight as a row (f32)
    # ctx_ref:     (TB, H_pad)         output context
    # attw_ref:    (TB, S_pad)         output attention weights
    x = out_ref[...]                                      # (TB, S_pad, H_pad) f32
    x2d = x.reshape(tb * s_pad, h_pad)

    # Cast the MXU LHS in-kernel (no extra HBM pass); accumulate in f32.
    lhs = x2d if x2d.dtype == jnp.dtype(mm_dtype) else x2d.astype(mm_dtype)
    e = jnp.dot(lhs, wattn_t_ref[...], preferred_element_type=jnp.float32)
    e = e.reshape(tb, s_pad, h_pad)
    # Bias already folded into hidden_last in the wrapper.
    energy = jnp.tanh(e + hlast_ref[...][:, None, :])     # EUP, f32

    # Score projection: VPU multiply + lane reduce over H (no N=1 matmul).
    scores = jnp.sum(energy * wscore_ref[...], axis=-1)   # (TB, S_pad) f32

    # Mask padded sequence positions (compile-time-constant branch).
    if s_pad != seq_len:
        col = jax.lax.broadcasted_iota(jnp.int32, (tb, s_pad), 1)
        scores = jnp.where(col < seq_len, scores, jnp.float32(-1e30))

    # Softmax over S (lane axis); one exact per-row reciprocal (cheap).
    m = jnp.max(scores, axis=-1, keepdims=True)
    p = jnp.exp(scores - m)
    denom = jnp.sum(p, axis=-1, keepdims=True)
    attn = p * pl.reciprocal(denom, approx=False)         # (TB, S_pad)

    # Context: VPU multiply + sublane reduce over S against the *f32* tile.
    ctx = jnp.sum(attn[:, :, None] * x, axis=1)           # (TB, H_pad) f32

    ctx_ref[...] = ctx.astype(ctx_ref.dtype)
    attw_ref[...] = attn.astype(attw_ref.dtype)


def attention_forward(out, hidden, w_attn, b_attn, w_score, *,
                      matmul_dtype=None):
    """Pallas port of Attention.forward.

    Args:
      out:     (B, S, H) float32 LSTM outputs.
      hidden:  (L, B, H) float32 LSTM hidden states.
      w_attn:  (H, H)  nn.Linear(hidden_dim, hidden_dim).weight
      b_attn:  (H,)    nn.Linear(hidden_dim, hidden_dim).bias
      w_score: (1, H)  nn.Linear(hidden_dim, 1, bias=False).weight
      matmul_dtype: dtype fed to the MXU for the energy matmul (cast happens
        inside the kernel). Use jnp.bfloat16 on v6e/v7x; default keeps f32.
    Returns:
      context:           (B, H)
      attention_weights: (B, S)
    """
    B, S, H = out.shape
    if matmul_dtype is None:
        matmul_dtype = out.dtype
    mm_itemsize = jnp.dtype(matmul_dtype).itemsize

    h_pad = _round_up(H, 128)                      # lane-dense H
    sub = 16 if mm_itemsize < 4 else 8             # packed-sublane multiple
    s_pad = _round_up(S, sub)

    vmem_cap = _vmem_capacity_bytes()
    multi_tc = _is_multi_tc_chip()
    tb, fp = _choose_batch_tile(B, s_pad, h_pad, mm_itemsize, vmem_cap,
                                multi_tc)
    b_pad = _round_up(B, tb)

    # Fold the Linear bias into hidden[-1]: tanh(out@W^T + b + h) ==
    # tanh(out@W^T + (h + b)).  Only a (B, H) add in the wrapper.
    hidden_last = hidden[-1] + b_attn                              # (B, H)

    out_p = _pad_to(out, (b_pad, s_pad, h_pad)).astype(jnp.float32)
    hlast_p = _pad_to(hidden_last, (b_pad, h_pad)).astype(jnp.float32)
    # TODO(synk): for very large H, K-tile / single-buffer this (H_pad, H_pad)
    # weight so its 2*H^2 VMEM residency stays bounded on v7x's 64 MiB VMEM.
    w_attn_t = _pad_to(w_attn.T, (h_pad, h_pad)).astype(matmul_dtype)
    w_score_row = _pad_to(w_score.reshape(1, H), (1, h_pad)).astype(jnp.float32)

    kernel = functools.partial(_attention_kernel, seq_len=S, tb=tb,
                               s_pad=s_pad, h_pad=h_pad,
                               mm_dtype=jnp.dtype(matmul_dtype))

    # Explicit scoped-VMEM limit derived from the footprint estimate and the
    # chip's VMEM capacity (64 MiB on v7x, 128 MiB on v5e/v6e).
    vmem_limit = int(min(max(2 * fp, 32 * 2**20),
                         max(int(0.9 * vmem_cap), 32 * 2**20)))

    grid = (b_pad // tb,)
    ctx_p, attw_p = pl.pallas_call(
        kernel,
        out_shape=(
            jax.ShapeDtypeStruct((b_pad, h_pad), out.dtype),
            jax.ShapeDtypeStruct((b_pad, s_pad), out.dtype),
        ),
        grid_spec=pltpu.PrefetchScalarGridSpec(
            num_scalar_prefetch=0,
            grid=grid,
            in_specs=[
                pl.BlockSpec((tb, s_pad, h_pad), lambda b: (b, 0, 0)),  # out
                pl.BlockSpec((tb, h_pad), lambda b: (b, 0)),     # hidden[-1]+b
                pl.BlockSpec((h_pad, h_pad), lambda b: (0, 0)),  # W_attn^T
                pl.BlockSpec((1, h_pad), lambda b: (0, 0)),      # w_score row
            ],
            out_specs=[
                pl.BlockSpec((tb, h_pad), lambda b: (b, 0)),     # context
                pl.BlockSpec((tb, s_pad), lambda b: (b, 0)),     # attn weights
            ],
        ),
        compiler_params=_CompilerParams(
            dimension_semantics=("parallel",),
            vmem_limit_bytes=vmem_limit),
    )(out_p, hlast_p, w_attn_t, w_score_row)

    return ctx_p[:B, :H], attw_p[:B, :S]


def _reference(out, hidden, w_attn, b_attn, w_score):
    # Pure-JAX reference mirroring the PyTorch forward.
    hidden_last = hidden[-1][:, None, :]                       # (B, 1, H)
    energy = jnp.tanh(out @ w_attn.T + b_attn + hidden_last)   # (B, S, H)
    scores = jnp.squeeze(energy @ w_score.T, -1)               # (B, S)
    attn = jax.nn.softmax(scores, axis=-1)                     # (B, S)
    context = jnp.einsum("bs,bsh->bh", attn, out)              # (B, H)
    return context, attn


def _make_inputs(key, B, S, H, L):
    k_out, k_hid, k_w, k_b, k_s = jax.random.split(key, 5)
    out = jax.random.normal(k_out, (B, S, H), dtype=jnp.float32)
    hidden = jax.random.normal(k_hid, (L, B, H), dtype=jnp.float32)
    bound = 1.0 / (H ** 0.5)
    w_attn = jax.random.uniform(k_w, (H, H), jnp.float32, -bound, bound)
    b_attn = jax.random.uniform(k_b, (H,), jnp.float32, -bound, bound)
    w_score = jax.random.uniform(k_s, (1, H), jnp.float32, -bound, bound)
    return out, hidden, w_attn, b_attn, w_score


if __name__ == "__main__":
    key = jax.random.PRNGKey(0)

    # Main config: matches the module spec shapes.
    B, S, H, L = 2, 8, 32, 2
    out, hidden, w_attn, b_attn, w_score = _make_inputs(key, B, S, H, L)

    ctx, attw = attention_forward(out, hidden, w_attn, b_attn, w_score)
    jax.block_until_ready((ctx, attw))
    ctx_ref, attw_ref = _reference(out, hidden, w_attn, b_attn, w_score)
    assert jnp.allclose(ctx, ctx_ref, atol=5e-3, rtol=5e-3)
    assert jnp.allclose(attw, attw_ref, atol=5e-3, rtol=5e-3)

    # bf16 MXU path (in-kernel cast); accumulation and context stay f32.
    ctx_bf, attw_bf = attention_forward(out, hidden, w_attn, b_attn, w_score,
                                        matmul_dtype=jnp.bfloat16)
    jax.block_until_ready((ctx_bf, attw_bf))
    assert jnp.allclose(ctx_bf, ctx_ref, atol=5e-2, rtol=5e-2)
    assert jnp.allclose(attw_bf, attw_ref, atol=5e-2, rtol=5e-2)

    # Ragged config: exercises S/H/B zero-padding + score masking paths.
    B2, S2, H2, L2 = 3, 5, 20, 1
    out2, hidden2, w2, b2, ws2 = _make_inputs(jax.random.PRNGKey(1),
                                              B2, S2, H2, L2)
    ctx2, attw2 = attention_forward(out2, hidden2, w2, b2, ws2)
    jax.block_until_ready((ctx2, attw2))
    ctx2_ref, attw2_ref = _reference(out2, hidden2, w2, b2, ws2)
    assert jnp.allclose(ctx2, ctx2_ref, atol=5e-3, rtol=5e-3)
    assert jnp.allclose(attw2, attw2_ref, atol=5e-3, rtol=5e-3)

    print("KERNEL_OK")
</pallas_src>

<mosaic_0001>
module attributes {stable_mosaic.version = 11 : i64} {
  func.func @_attention_kernel(%arg0: i32, %arg1: memref<2x8x128xf32, #tpu.memory_space<vmem>>, %arg2: memref<2x128xf32, #tpu.memory_space<vmem>>, %arg3: memref<128x128xf32, #tpu.memory_space<vmem>>, %arg4: memref<1x128xf32, #tpu.memory_space<vmem>>, %arg5: memref<2x128xf32, #tpu.memory_space<vmem>>, %arg6: memref<2x8xf32, #tpu.memory_space<vmem>>) attributes {dimension_semantics = [#tpu.dimension_semantics<parallel>], iteration_bounds = array<i64: 1>, scalar_prefetch = 0 : i64, scratch_operands = 0 : i64, tpu.core_type = #tpu.core_type<tc>, window_params = [{transform_indices = @transform_0, window_bounds = array<i64: 2, 8, 128>}, {transform_indices = @transform_1, window_bounds = array<i64: 2, 128>}, {pipeline_mode = #tpu.pipeline_mode<synchronous>, transform_indices = @transform_2, window_bounds = array<i64: 128, 128>}, {pipeline_mode = #tpu.pipeline_mode<synchronous>, transform_indices = @transform_3, window_bounds = array<i64: 1, 128>}, {transform_indices = @transform_4, window_bounds = array<i64: 2, 128>}, {transform_indices = @transform_5, window_bounds = array<i64: 2, 8>}]} {
    %c0 = arith.constant 0 : index
    %c0_0 = arith.constant 0 : index
    %c0_1 = arith.constant 0 : index
    %0 = vector.load %arg1[%c0, %c0_0, %c0_1] : memref<2x8x128xf32, #tpu.memory_space<vmem>>, vector<2x8x128xf32>
    %1 = vector.shape_cast %0 : vector<2x8x128xf32> to vector<16x128xf32>
    %c0_2 = arith.constant 0 : index
    %c0_3 = arith.constant 0 : index
    %2 = vector.load %arg3[%c0_2, %c0_3] : memref<128x128xf32, #tpu.memory_space<vmem>>, vector<128x128xf32>
    %cst = arith.constant dense<0.000000e+00> : vector<16x128xf32>
    %3 = tpu.matmul %1, %2, %cst {dimension_numbers = #tpu.dot_dimension_numbers<[1], [0], [0], [1], [0, 0, 1, 1], [], []>} : vector<16x128xf32>, vector<128x128xf32>, vector<16x128xf32> -> vector<16x128xf32>
    %4 = vector.shape_cast %3 : vector<16x128xf32> to vector<2x8x128xf32>
    %c0_4 = arith.constant 0 : index
    %c0_5 = arith.constant 0 : index
    %5 = vector.load %arg2[%c0_4, %c0_5] : memref<2x128xf32, #tpu.memory_space<vmem>>, vector<2x128xf32>
    %6 = vector.shape_cast %5 : vector<2x128xf32> to vector<2x1x128xf32>
    %7 = vector.broadcast %6 : vector<2x1x128xf32> to vector<2x8x128xf32>
    %8 = arith.addf %4, %7 : vector<2x8x128xf32>
    %9 = math.tanh %8 : vector<2x8x128xf32>
    %c0_6 = arith.constant 0 : index
    %c0_7 = arith.constant 0 : index
    %10 = vector.load %arg4[%c0_6, %c0_7] : memref<1x128xf32, #tpu.memory_space<vmem>>, vector<1x128xf32>
    %11 = vector.shape_cast %10 : vector<1x128xf32> to vector<1x1x128xf32>
    %12 = vector.broadcast %11 : vector<1x1x128xf32> to vector<2x8x128xf32>
    %13 = arith.mulf %9, %12 : vector<2x8x128xf32>
    %cst_8 = arith.constant dense<0.000000e+00> : vector<2x8xf32>
    %14 = vector.multi_reduction <add>, %13, %cst_8 [2] : vector<2x8x128xf32> to vector<2x8xf32>
    %cst_9 = arith.constant dense<0xFF800000> : vector<2xf32>
    %15 = vector.multi_reduction <maximumf>, %14, %cst_9 [1] : vector<2x8xf32> to vector<2xf32>
    %16 = vector.shape_cast %15 : vector<2xf32> to vector<2x1xf32>
    %17 = vector.broadcast %16 : vector<2x1xf32> to vector<2x8xf32>
    %18 = arith.subf %14, %17 : vector<2x8xf32>
    %19 = math.exp %18 : vector<2x8xf32>
    %cst_10 = arith.constant dense<0.000000e+00> : vector<2xf32>
    %20 = vector.multi_reduction <add>, %19, %cst_10 [1] : vector<2x8xf32> to vector<2xf32>
    %21 = vector.shape_cast %20 : vector<2xf32> to vector<2x1xf32>
    %22 = tpu.reciprocal %21 : vector<2x1xf32> -> vector<2x1xf32>
    %23 = vector.broadcast %22 : vector<2x1xf32> to vector<2x8xf32>
    %24 = arith.mulf %19, %23 : vector<2x8xf32>
    %25 = vector.shape_cast %24 : vector<2x8xf32> to vector<2x8x1xf32>
    %26 = vector.broadcast %25 : vector<2x8x1xf32> to vector<2x8x128xf32>
    %27 = arith.mulf %26, %0 : vector<2x8x128xf32>
    %cst_11 = arith.constant dense<0.000000e+00> : vector<2x128xf32>
    %28 = vector.multi_reduction <add>, %27, %cst_11 [1] : vector<2x8x128xf32> to vector<2x128xf32>
    %c0_12 = arith.constant 0 : index
    %c0_13 = arith.constant 0 : index
    %29 = vector.load %arg5[%c0_12, %c0_13] : memref<2x128xf32, #tpu.memory_space<vmem>>, vector<2x128xf32>
    tpu.vector_store %arg5[%c0_12, %c0_13], %28 {strides = array<i32>} : memref<2x128xf32, #tpu.memory_space<vmem>>, vector<2x128xf32>,
    %c0_14 = arith.constant 0 : index
    %c0_15 = arith.constant 0 : index
    %30 = vector.load %arg6[%c0_14, %c0_15] : memref<2x8xf32, #tpu.memory_space<vmem>>, vector<2x8xf32>
    tpu.vector_store %arg6[%c0_14, %c0_15], %24 {strides = array<i32>} : memref<2x8xf32, #tpu.memory_space<vmem>>, vector<2x8xf32>,
    return
  }
  func.func @transform_0(%arg0: i32) -> (i32, i32, i32) {
    %c0_i32 = arith.constant 0 : i32
    %c0_i32_0 = arith.constant 0 : i32
    %c0_i32_1 = arith.constant 0 : i32
    return %arg0, %c0_i32, %c0_i32_0 : i32, i32, i32
  }
  func.func @transform_1(%arg0: i32) -> (i32, i32) {
    %c0_i32 = arith.constant 0 : i32
    %c0_i32_0 = arith.constant 0 : i32
    return %arg0, %c0_i32 : i32, i32
  }
  func.func @transform_2(%arg0: i32) -> (i32, i32) {
    %c0_i32 = arith.constant 0 : i32
    %c0_i32_0 = arith.constant 0 : i32
    %c0_i32_1 = arith.constant 0 : i32
    return %c0_i32, %c0_i32_0 : i32, i32
  }
  func.func @transform_3(%arg0: i32) -> (i32, i32) {
    %c0_i32 = arith.constant 0 : i32
    %c0_i32_0 = arith.constant 0 : i32
    %c0_i32_1 = arith.constant 0 : i32
    return %c0_i32, %c0_i32_0 : i32, i32
  }
  func.func @transform_4(%arg0: i32) -> (i32, i32) {
    %c0_i32 = arith.constant 0 : i32
    %c0_i32_0 = arith.constant 0 : i32
    return %arg0, %c0_i32 : i32, i32
  }
  func.func @transform_5(%arg0: i32) -> (i32, i32) {
    %c0_i32 = arith.constant 0 : i32
    %c0_i32_0 = arith.constant 0 : i32
    return %arg0, %c0_i32 : i32, i32
  }
}

</mosaic_0001>

<bundles_post_ra>
// kernel: tpu_custom_call.1
= control target key start
LH: loop header
LB: loop body
LE: loop exit
PB: predicated region body
PF: predicated region fallthrough
CT: control target
= control target key end

     0   :  { %11 = vsyncpa [#allocation3], 0  ;;  %s501_s0 = inlined_call_operand.hbm [shape: f32[2,8,128], index: 0, kind: input, shape index: {}]   ;;  %s502_s1 = inlined_call_operand.hbm [shape: f32[2,128], index: 1, kind: input, shape index: {}]   ;;  %s503_s2 = inlined_call_operand.hbm [shape: f32[128,128], index: 2, kind: input, shape index: {}]   ;;  %s504_s3 = inlined_call_operand.vmem [shape: f32[1,128], index: 3, kind: input, shape index: {}]   ;;  %s505_s4 = inlined_call_operand.hbm [shape: f32[2,128], index: 4, kind: output, shape index: {0}]   ;;  %s506_s5 = inlined_call_operand.hbm [shape: f32[2,8], index: 5, kind: output, shape index: {1}]  }
   0x1   :  { %12 = vsyncpa [#allocation6], 0 }
   0x2   :  { %13 = vsyncpa [#allocation4], 0  ;;  %s33_s20 = sshll.u32 %s502_s1, 4  ;;  %s34_s20 = int_to_ptr.hbm [resolvable:$true] %s33_s20 }
   0x3   :  { %14 = vsyncpa [#allocation10], 0  ;;  %s422_s21 = smov [#allocation5]   ;;  %s19_s25 = sshll.u32 %s501_s0, 4  ;;  %s20_s25 = int_to_ptr.hbm [resolvable:$true] %s19_s25 }
   0x4   :  { %s35_s22 = sshll.u32 %s422_s21, 4  ;;  %s423_s26 = smov [#allocation2]   ;;  %s36_s22 = int_to_ptr.vmem [resolvable:$true] %s35_s22 }
   0x5   :  { %38 = dma.hbm_to_vmem [thread:$0]  %s34_s20, 32, %s36_s22, [#allocation6]  }
   0x6   :  { %s21_s27 = sshll.u32 %s423_s26, 4  ;;  %s424_s28 = smov 128   ;;  %s22_s27 = int_to_ptr.vmem [resolvable:$true] %s21_s27 }
   0x7   :  { %s425_s29 = smov 8   ;;  %s43_s1 = sshll.u32 %s503_s2, 4  ;;  %s44_s1 = int_to_ptr.hbm [resolvable:$true] %s43_s1 }
   0x8   :  { %27 = dma.hbm_to_vmem [thread:$0]  %s20_s25, 256, %s22_s27, [#allocation3], %s424_s28, %s424_s28, %s425_s29  }
   0x9   :  { %s426_s7 = smov [#allocation7]  }
   0xa   :  { %s45_s8 = sshll.u32 %s426_s7, 4  ;;  %s46_s8 = int_to_ptr.vmem [resolvable:$true] %s45_s8 }
   0xb   :  { %51 = dma.hbm_to_vmem [thread:$0]  %s44_s1, 2048, %s46_s8, [#allocation6], %s424_s28, %s424_s28, %s425_s29  }
   0xc   :  { %414 = dma.done.wait [#allocation3], 256  }
   0xd   :  { %415 = vsyncadd [#allocation3], 4294967040 }
   0xe   :  { %416 = dma.done.wait [#allocation6], 2080  }
   0xf   :  { %417 = vsyncadd [#allocation6], 4294965216  ;;  %v83_v0 = vld [vmem:[#allocation7 + $0x78] sm:$0xff]  ;;  %v82_v1 = vld [vmem:[#allocation7 + $0x70] sm:$0xff]  ;;  %v130_v32 = vlaneseq  ;;  %vm134_vm0 = vcmask 1041409   ;;  %vm137_vm1 = vcmask 58368  }
  0x10   :  { %84 = vmatpush.msra.mxu0 %v83_v0  ;;  %256 = vmatpush.msra.mxu1 %v83_v0  ;;  %v81_v2 = vld [vmem:[#allocation7 + $0x68] sm:$0xff]  ;;  %v80_v3 = vld [vmem:[#allocation7 + $0x60] sm:$0xff]  ;;  %v79_v4 = vld [vmem:[#allocation7 + $0x58] sm:$0xff]  ;;  %v427_v39 = vmov 0   ;;  %s240_s12 = sshll.u32 %s506_s5, 4  ;;  %s429_s5 = smov [#allocation8]   ;;  %s241_s12 = int_to_ptr.hbm [resolvable:$true] %s240_s12 }
  0x11   :  { %v78_v5 = vld [vmem:[#allocation7 + $0x50] sm:$0xff]  ;;  %v77_v6 = vld [vmem:[#allocation7 + $0x48] sm:$0xff]  ;;  %v76_v7 = vld [vmem:[#allocation7 + $0x40] sm:$0xff]  ;;  %v478_v33 = vand.u32 127, %v130_v32  ;;  %281 = vset.pattern.permute.xlu2 %v427_v39  ;;  %280 = vset.pattern.permute.xlu1 %v427_v39  ;;  %s227_s13 = sshll.u32 %s429_s5, 4  ;;  %s229_s16 = sshll.u32 %s505_s4, 4  ;;  %s228_s13 = int_to_ptr.vmem [resolvable:$true] %s227_s13  ;;  %s230_s16 = int_to_ptr.hbm [resolvable:$true] %s229_s16 }
  0x12   :  { %85 = vmatpush.msra.mxu0 %v82_v1  ;;  %257 = vmatpush.msra.mxu1 %v82_v1  ;;  %v75_v8 = vld [vmem:[#allocation7 + $0x38] sm:$0xff]  ;;  %v74_v9 = vld [vmem:[#allocation7 + $0x30] sm:$0xff]  ;;  %v73_v10 = vld [vmem:[#allocation7 + $0x28] sm:$0xff] }
  0x13   :  { %v72_v11 = vld [vmem:[#allocation7 + $0x20] sm:$0xff]  ;;  %v71_v12 = vld [vmem:[#allocation7 + $0x18] sm:$0xff]  ;;  %v70_v13 = vld [vmem:[#allocation7 + $0x10] sm:$0xff]  ;;  %282 = vset.pattern.permute.xlu0 %v427_v39 }
  0x14   :  { %86 = vmatpush.msra.mxu0 %v81_v2  ;;  %258 = vmatpush.msra.mxu1 %v81_v2  ;;  %v69_v14 = vld [vmem:[#allocation7 + $0x8] sm:$0xff]  ;;  %v68_v15 = vld [vmem:[#allocation7] sm:$0xff]  ;;  %v471_v17 = vld [vmem:[#allocation2 + $0x8] sm:$0xff] }
  0x15   :  { %v469_v16 = vld [vmem:[#allocation2] sm:$0xff]  ;;  %v107_v18 = vld [vmem:[#allocation5] sm:$0x3] }
  0x16   :  { %87 = vmatpush.msra.mxu0 %v80_v3  ;;  %259 = vmatpush.msra.mxu1 %v80_v3  ;;  %v109_v19 = vrot.slane %v107_v18, 1  ;;  %v110_v20 = vperm.slane %v107_v18, 0  ;;  %v283_v26 = vld [vmem:[%s504_s3] ss:$0 sm:$0xff]  ;;  %s428_s3 = smov [#allocation9]  }
  0x17   :  { %s238_s9 = sshll.u32 %s428_s3, 4  ;;  %s239_s9 = int_to_ptr.vmem [resolvable:$true] %s238_s9 }
  0x18   :  { %88 = vmatpush.msra.mxu0 %v79_v4  ;;  %260 = vmatpush.msra.mxu1 %v79_v4  ;;  %v111_v21 = vperm.slane %v109_v19, 0 }
  0x1a   :  { %89 = vmatpush.msra.mxu0 %v78_v5  ;;  %261 = vmatpush.msra.mxu1 %v78_v5 }
  0x1c   :  { %90 = vmatpush.msra.mxu0 %v77_v6  ;;  %262 = vmatpush.msra.mxu1 %v77_v6 }
  0x1e   :  { %91 = vmatpush.msra.mxu0 %v76_v7  ;;  %263 = vmatpush.msra.mxu1 %v76_v7 }
  0x20   :  { %92 = vmatpush.msra.mxu0 %v75_v8  ;;  %264 = vmatpush.msra.mxu1 %v75_v8 }
  0x22   :  { %93 = vmatpush.msra.mxu0 %v74_v9  ;;  %265 = vmatpush.msra.mxu1 %v74_v9 }
  0x24   :  { %94 = vmatpush.msra.mxu0 %v73_v10  ;;  %266 = vmatpush.msra.mxu1 %v73_v10 }
  0x26   :  { %95 = vmatpush.msra.mxu0 %v72_v11  ;;  %267 = vmatpush.msra.mxu1 %v72_v11 }
  0x28   :  { %96 = vmatpush.msra.mxu0 %v71_v12  ;;  %268 = vmatpush.msra.mxu1 %v71_v12 }
  0x2a   :  { %97 = vmatpush.msra.mxu0 %v70_v13  ;;  %269 = vmatpush.msra.mxu1 %v70_v13 }
  0x2c   :  { %98 = vmatpush.msra.mxu0 %v69_v14  ;;  %270 = vmatpush.msra.mxu1 %v69_v14 }
  0x2e   :  { %99 = vmatpush.msra.mxu0 %v68_v15  ;;  %271 = vmatpush.msra.mxu1 %v68_v15 }
  0x2f   :  { %100 = vmatmul.f32.vlgmr.msra.gmra.mxu0 %v469_v16  ;;  %103 = vmatmul.f32.vlgmr.msra.gmra.mxu1 %v471_v17 }
  0xac   :  { %v101_v22 = vpop.f32.mrf.mxu0  ;;  %v104_v23 = vpop.f32.mrf.mxu1 }
  0xad   :  { %v114_v24 = vadd.f32 %v110_v20, %v101_v22  ;;  %v115_v25 = vadd.f32 %v111_v21, %v104_v23 }
  0xaf   :  { %284 = vtanh.f32 %v114_v24 }
  0xb0   :  { %286 = vtanh.f32 %v115_v25 }
  0xb5   :  { %v285_v27 = vpop.eup %284 }
  0xb6   :  { %v122_v28 = vmul.f32 %v285_v27, %v283_v26  ;;  %v287_v29 = vpop.eup %286 }
  0xb7   :  { %v123_v30 = vmul.f32 %v287_v29, %v283_v26 }
  0xb8   :  { %124 = vadd.xlane.f32.xlu0 %v122_v28 }
  0xc0   :  { %126 = vadd.xlane.f32.xlu0 %v123_v30 }
 0x12b   :  { %v125_v31 = vpop.xlane.xlu0 %124 }
 0x12c   :  { %v132_v35 = vperm.slane %v125_v31, %v478_v33 }
 0x133   :  { %v127_v34 = vpop.xlane.xlu0 %126 }
 0x134   :  { %v133_v36 = vperm.slane %v127_v34, %v478_v33 }
 0x136   :  { %v135_v37 = vsel %vm134_vm0, %v133_v36, %v132_v35 }
 0x137   :  { %v138_v38 = vsel %vm137_vm1, %v135_v37, -inf }
 0x138   :  { %139 = vmax.xlane.f32.xlu1 %v138_v38 }
 0x1ab   :  { %v140_v40 = vpop.xlane.xlu1 %139 }
 0x1ac   :  { %v142_v41 = vperm.slane %v140_v40, 0  ;;  %v143_v42 = vperm.slane %v140_v40, 1 }
 0x1ae   :  { %v146_v43 = vsub.f32 %v125_v31, %v142_v41  ;;  %v147_v44 = vsub.f32 %v127_v34, %v143_v42 }
 0x1b0   :  { %v148_v45 = vmul.f32 1.442695, %v146_v43  ;;  %v150_v46 = vmul.f32 1.442695, %v147_v44 }
 0x1b2   :  { %288 = vpow2.f32 %v148_v45 }
 0x1b3   :  { %290 = vpow2.f32 %v150_v46 }
 0x1b8   :  { %v289_v47 = vpop.eup %288 }
 0x1b9   :  { %v291_v48 = vpop.eup %290  ;;  %155 = vperm.xlu1 %280, %v289_v47  }
 0x1ba   :  { %158 = vperm.xlu2 %281, %v291_v48  }
 0x214   :  { %v159_v49 = vpop.permute.xlu2 %158 }
 0x215   :  { %v161_v51 = vperm.slane %v159_v49, %v478_v33 }
 0x22b   :  { %v156_v50 = vpop.permute.xlu1 %155 }
 0x22c   :  { %v160_v52 = vperm.slane %v156_v50, %v478_v33 }
 0x22e   :  { %v162_v53 = vsel %vm134_vm0, %v161_v51, %v160_v52 }
 0x22f   :  { %v164_v54 = vsel %vm137_vm1, %v162_v53, 0.0 }
 0x230   :  { %165 = vadd.xlane.f32.xlu2 %v164_v54 }
 0x2a3   :  { %v166_v55 = vpop.xlane.xlu2 %165 }
 0x2a4   :  { %292 = vrcp.f32 %v166_v55  ;;  %v178_v59 = vand.u32 2147483648, %v166_v55  ;;  %v176_v61 = vand.u32 2147483647, %v166_v55  ;;  %vm172_vm3 = vweird.f32 %v166_v55 }
 0x2a6   :  { %v179_v63 = vor.u32 1.1754944e-38, %v178_v59  ;;  %vm177_vm5 = vcmp.eq.f32.partialorder %v176_v61, 8.507059e+37 }
 0x2aa   :  { %v293_v56 = vpop.eup %292 }
 0x2ab   :  { %v168_v57 = vmul.f32 %v293_v56, %v166_v55  ;;  %vm173_vm2 = vweird.f32 %v293_v56 }
 0x2ac   :  { %vm174_vm4 = vmor %vm172_vm3, %vm173_vm2 }
 0x2ad   :  { %v169_v58 = vsub.f32 1.0, %v168_v57 }
 0x2af   :  { %v170_v60 = vmul.f32 %v293_v56, %v169_v58 }
 0x2b1   :  { %v171_v62 = vadd.f32 %v293_v56, %v170_v60 }
 0x2b3   :  { %v175_v0 = vsel %vm174_vm4, %v293_v56, %v171_v62 }
 0x2b4   :  { %v180_v1 = vsel %vm177_vm5, %v179_v63, %v175_v0 }
 0x2b5   :  { %v183_v2 = vperm.slane %v180_v1, 1  ;;  %v182_v3 = vperm.slane %v180_v1, 0 }
 0x2b7   :  { %v187_v4 = vmul.f32 %v291_v48, %v183_v2  ;;  %v186_v5 = vmul.f32 %v289_v47, %v182_v3 }
 0x2b9   :  { %195 = vperm.xlu1 %280, %v187_v4   ;;  %190 = vperm.xlu0 %282, %v186_v5  }
 0x32b   :  { %v196_v6 = vpop.permute.xlu1 %195  ;;  %v191_v7 = vpop.permute.xlu0 %190 }
 0x32c   :  { %v199_v8 = vmul.f32 %v196_v6, %v471_v17  ;;  %v218_v9 = vperm.slane %v196_v6, %v478_v33  ;;  %v198_v10 = vmul.f32 %v191_v7, %v469_v16  ;;  %v217_v11 = vperm.slane %v191_v7, %v478_v33 }
 0x32e   :  { %v206_v12 = vrot.slane %v199_v8, 4  ;;  %v200_v13 = vrot.slane %v198_v10, 4  ;;  %v219_v14 = vsel %vm134_vm0, %v218_v9, %v217_v11 }
 0x32f   :  { %221 = vst.msk [vmem:[#allocation9] sm:$0x3] %vm137_vm1, %v219_v14 }
 0x330   :  { %v207_v15 = vadd.f32 %v206_v12, %v199_v8  ;;  %v201_v18 = vadd.f32 %v200_v13, %v198_v10  ;;  %243 = dma.vmem_to_hbm [thread:$0]  %s239_s9, 32, %s241_s12, [#allocation10]  }
 0x332   :  { %v208_v19 = vrot.slane %v207_v15, 2  ;;  %v202_v20 = vrot.slane %v201_v18, 2 }
 0x334   :  { %v209_v17 = vadd.f32 %v208_v19, %v207_v15  ;;  %v203_v21 = vadd.f32 %v202_v20, %v201_v18 }
 0x336   :  { %v210_v22 = vrot.slane %v209_v17, 1  ;;  %v204_v23 = vrot.slane %v203_v21, 1 }
 0x338   :  { %v211_v16 = vadd.f32 %v210_v22, %v209_v17  ;;  %v205_v24 = vadd.f32 %v204_v23, %v203_v21 }
 0x33a   :  { %v214_v25 = vsel %vm134_vm0, %v211_v16, %v205_v24 }
 0x33b   :  { %216 = vst [vmem:[#allocation8] sm:$0x3] %v214_v25 }
 0x33c   :  { %232 = dma.vmem_to_hbm [thread:$0]  %s228_s13, 32, %s230_s16, [#allocation4]  }
 0x33d   :  { %418 = dma.done.wait [#allocation4], 32  }
 0x33e   :  { %419 = vsyncadd [#allocation4], 4294967264 }
 0x33f   :  { %420 = dma.done.wait [#allocation10], 32  }
 0x340   :  { %421 = vsyncadd [#allocation10], 4294967264 }
 0x341   :  { %252 = vsyncpa [#allocation3], 1 }
 0x342   :  { %253 = vsyncpa [#allocation6], 1 }
 0x343   :  { %254 = vsyncpa [#allocation4], 1 }
 0x344   :  { %255 = vsyncpa [#allocation10], 1 }

</bundles_post_ra>
